<compile_context>
chip_gen: v7x
topology: tpu7x:2x2x1
jax: 0.10.0
libtpu: 0.0.40
codegen_flags: <defaults>
</compile_context>

<pallas_src>
import functools

import jax
import jax.numpy as jnp
from jax.experimental import pallas as pl
from jax.experimental.pallas import tpu as pltpu


def _round_up(x, m):
    return ((x + m - 1) // m) * m


def vae_kernel(x_ref, w1_ref, b1_ref, wml_ref, bml_ref, eps_ref,
               w2_ref, b2_ref, w3_ref, b3_ref,
               out_ref, mulv_ref):
    """One batch tile of the fused VAE forward pass."""
    z_dim = eps_ref.shape[-1]

    # ---- Encoder ----
    h = jnp.dot(x_ref[...], w1_ref[...],
                preferred_element_type=jnp.float32) + b1_ref[...]
    h = jnp.maximum(h, 0.0).astype(jnp.bfloat16)

    # Fused mu/logvar head: one MXU pass, lane-dense (2*LATENT) result.
    mulv = jnp.dot(h, wml_ref[...],
                   preferred_element_type=jnp.float32) + bml_ref[...]
    mu = mulv[:, :z_dim]
    logvar = mulv[:, z_dim:]

    # ---- Reparameterization (VPU + EUP): z = mu + exp(0.5*logvar) * eps ----
    z = mu + jnp.exp(0.5 * logvar) * eps_ref[...]

    # ---- Decoder ----
    h2 = jnp.dot(z.astype(jnp.bfloat16), w2_ref[...],
                 preferred_element_type=jnp.float32) + b2_ref[...]
    h2 = jnp.maximum(h2, 0.0).astype(jnp.bfloat16)
    logits = jnp.dot(h2, w3_ref[...],
                     preferred_element_type=jnp.float32) + b3_ref[...]

    out_ref[...] = jax.nn.sigmoid(logits)
    mulv_ref[...] = mulv          # packed (mu | logvar), split in the wrapper


@functools.partial(jax.jit, static_argnames=("tb",))
def vae_forward(x, params, eps, *, tb=128):
    """Runs the fused VAE forward kernel. Returns (reconstruction, mu, logvar)."""
    B, D = x.shape
    Z = eps.shape[1]
    H = params["w1"].shape[1]

    # bf16 MXU operands (f32 accumulation in-kernel); biases stay f32 since
    # they are added to the f32 accumulator.
    x_bf = x.astype(jnp.bfloat16)
    w1 = params["w1"].astype(jnp.bfloat16)
    wml = jnp.concatenate([params["wmu"], params["wlv"]], axis=1).astype(jnp.bfloat16)
    bml = jnp.concatenate([params["bmu"], params["blv"]], axis=1)
    w2 = params["w2"].astype(jnp.bfloat16)
    w3 = params["w3"].astype(jnp.bfloat16)
    b1, b2, b3 = params["b1"], params["b2"], params["b3"]

    # Batch tile: keep the sublane dim a multiple of 8; pad the batch so the
    # grid covers it exactly (rows independent; padding sliced off below).
    tb = min(tb, _round_up(B, 8))
    Bp = _round_up(B, tb)
    if Bp != B:
        x_bf = jnp.pad(x_bf, ((0, Bp - B), (0, 0)))
        eps = jnp.pad(eps, ((0, Bp - B), (0, 0)))
    grid = (Bp // tb,)

    def batch_spec(cols):
        return pl.BlockSpec((tb, cols), lambda i: (i, 0))

    def resident(shape):
        # Constant index_map -> weight/bias block re-used (VMEM-resident)
        # across all batch grid steps.
        return pl.BlockSpec(shape, lambda i: (0, 0))

    flops = 2 * Bp * (D * H + H * 2 * Z + Z * H + H * D)
    transcendentals = Bp * (Z + D)          # exp in reparam + sigmoid
    bytes_accessed = (
        x_bf.size * 2 + eps.size * 4
        + (w1.size + wml.size + w2.size + w3.size) * 2
        + (b1.size + bml.size + b2.size + b3.size) * 4
        + Bp * D * 4 + Bp * 2 * Z * 4)

    # NOTE: at these sizes VMEM use is tiny; if HIDDEN/D grow (e.g. 784x400
    # MNIST VAE) budget 2x double-buffered batch tiles + resident weights
    # against v7x's 64 MiB and set vmem_limit_bytes accordingly.
    out, mulv = pl.pallas_call(
        vae_kernel,
        out_shape=(
            jax.ShapeDtypeStruct((Bp, D), jnp.float32),       # reconstruction
            jax.ShapeDtypeStruct((Bp, 2 * Z), jnp.float32),   # packed mu|logvar
        ),
        grid=grid,
        in_specs=[
            batch_spec(D),          # x
            resident(w1.shape),     # w1
            resident(b1.shape),     # b1
            resident(wml.shape),    # fused (wmu | wlv)
            resident(bml.shape),    # fused (bmu | blv)
            batch_spec(Z),          # eps
            resident(w2.shape),     # w2
            resident(b2.shape),     # b2
            resident(w3.shape),     # w3
            resident(b3.shape),     # b3
        ],
        out_specs=(batch_spec(D), batch_spec(2 * Z)),
        compiler_params=pltpu.CompilerParams(
            dimension_semantics=("parallel",),   # v7x: batch tiles over 2 TCs
        ),
        cost_estimate=pl.CostEstimate(
            flops=flops,
            transcendentals=transcendentals,
            bytes_accessed=bytes_accessed),
    )(x_bf, w1, b1, wml, bml, eps, w2, b2, w3, b3)

    out = out[:B]
    mu = mulv[:B, :Z]
    logvar = mulv[:B, Z:]
    return out, mu, logvar


def _reference(x, params, eps):
    """Pure-JAX reference mirroring the kernel's bf16/f32 mixed precision."""
    bf, f32 = jnp.bfloat16, jnp.float32
    h = jnp.dot(x.astype(bf), params["w1"].astype(bf),
                preferred_element_type=f32) + params["b1"]
    h = jnp.maximum(h, 0.0).astype(bf)
    mu = jnp.dot(h, params["wmu"].astype(bf), preferred_element_type=f32) + params["bmu"]
    lv = jnp.dot(h, params["wlv"].astype(bf), preferred_element_type=f32) + params["blv"]
    z = (mu + jnp.exp(0.5 * lv) * eps).astype(bf)
    h2 = jnp.dot(z, params["w2"].astype(bf), preferred_element_type=f32) + params["b2"]
    h2 = jnp.maximum(h2, 0.0).astype(bf)
    out = jax.nn.sigmoid(
        jnp.dot(h2, params["w3"].astype(bf), preferred_element_type=f32) + params["b3"])
    return out, mu, lv


def init_params(key, d_in, hidden, latent):
    ks = jax.random.split(key, 6)
    s = 0.1
    return {
        "w1":  s * jax.random.normal(ks[0], (d_in, hidden), jnp.float32),
        "b1":  jnp.zeros((1, hidden), jnp.float32),
        "wmu": s * jax.random.normal(ks[1], (hidden, latent), jnp.float32),
        "bmu": jnp.zeros((1, latent), jnp.float32),
        "wlv": s * jax.random.normal(ks[2], (hidden, latent), jnp.float32),
        "blv": jnp.zeros((1, latent), jnp.float32),
        "w2":  s * jax.random.normal(ks[3], (latent, hidden), jnp.float32),
        "b2":  jnp.zeros((1, hidden), jnp.float32),
        "w3":  s * jax.random.normal(ks[4], (hidden, d_in), jnp.float32),
        "b3":  jnp.zeros((1, d_in), jnp.float32),
    }


if __name__ == "__main__":
    # Lane-friendly small shapes: D_IN/HIDDEN = 128, 2*LATENT = 128; the batch
    # gives a 2-step grid so pipelining + "parallel" semantics are exercised.
    B, D_IN, HIDDEN, LATENT = 256, 128, 128, 64

    key = jax.random.PRNGKey(0)
    k_param, k_x, k_eps = jax.random.split(key, 3)

    params = init_params(k_param, D_IN, HIDDEN, LATENT)
    x = jax.random.normal(k_x, (B, D_IN), jnp.float32)
    # epsilon ~ N(0,1) like torch.randn_like; drawn host-side so the reference
    # consumes the exact same noise.
    # TODO(synk): for production, draw eps in-kernel via pltpu.prng_seed +
    # pltpu.prng_random_bits to drop one HBM input stream per step.
    eps = jax.random.normal(k_eps, (B, LATENT), jnp.float32)

    out, mu, lv = vae_forward(x, params, eps)
    jax.block_until_ready((out, mu, lv))

    ref_out, ref_mu, ref_lv = _reference(x, params, eps)
    assert out.shape == (B, D_IN) and mu.shape == (B, LATENT) and lv.shape == (B, LATENT)
    # bf16 MXU operands -> loosened tolerance vs. an all-f32 check.
    assert jnp.allclose(out, ref_out, atol=1e-2, rtol=1e-2)
    assert jnp.allclose(mu, ref_mu, atol=1e-2, rtol=1e-2)
    assert jnp.allclose(lv, ref_lv, atol=1e-2, rtol=1e-2)

    print("KERNEL_OK")
</pallas_src>

<mosaic_0001>
module attributes {stable_mosaic.version = 11 : i64} {
  func.func @vae_kernel(%arg0: i32, %arg1: memref<128x128xbf16, #tpu.memory_space<vmem>>, %arg2: memref<128x128xbf16, #tpu.memory_space<vmem>>, %arg3: memref<1x128xf32, #tpu.memory_space<vmem>>, %arg4: memref<128x128xbf16, #tpu.memory_space<vmem>>, %arg5: memref<1x128xf32, #tpu.memory_space<vmem>>, %arg6: memref<128x64xf32, #tpu.memory_space<vmem>>, %arg7: memref<64x128xbf16, #tpu.memory_space<vmem>>, %arg8: memref<1x128xf32, #tpu.memory_space<vmem>>, %arg9: memref<128x128xbf16, #tpu.memory_space<vmem>>, %arg10: memref<1x128xf32, #tpu.memory_space<vmem>>, %arg11: memref<128x128xf32, #tpu.memory_space<vmem>>, %arg12: memref<128x128xf32, #tpu.memory_space<vmem>>) attributes {dimension_semantics = [#tpu.dimension_semantics<parallel>], iteration_bounds = array<i64: 2>, scalar_prefetch = 0 : i64, scratch_operands = 0 : i64, tpu.core_type = #tpu.core_type<tc>, window_params = [{transform_indices = @transform_0, window_bounds = array<i64: 128, 128>}, {pipeline_mode = #tpu.pipeline_mode<synchronous>, transform_indices = @transform_1, window_bounds = array<i64: 128, 128>}, {pipeline_mode = #tpu.pipeline_mode<synchronous>, transform_indices = @transform_2, window_bounds = array<i64: 1, 128>}, {pipeline_mode = #tpu.pipeline_mode<synchronous>, transform_indices = @transform_3, window_bounds = array<i64: 128, 128>}, {pipeline_mode = #tpu.pipeline_mode<synchronous>, transform_indices = @transform_4, window_bounds = array<i64: 1, 128>}, {transform_indices = @transform_5, window_bounds = array<i64: 128, 64>}, {pipeline_mode = #tpu.pipeline_mode<synchronous>, transform_indices = @transform_6, window_bounds = array<i64: 64, 128>}, {pipeline_mode = #tpu.pipeline_mode<synchronous>, transform_indices = @transform_7, window_bounds = array<i64: 1, 128>}, {pipeline_mode = #tpu.pipeline_mode<synchronous>, transform_indices = @transform_8, window_bounds = array<i64: 128, 128>}, {pipeline_mode = #tpu.pipeline_mode<synchronous>, transform_indices = @transform_9, window_bounds = array<i64: 1, 128>}, {transform_indices = @transform_10, window_bounds = array<i64: 128, 128>}, {transform_indices = @transform_11, window_bounds = array<i64: 128, 128>}]} {
    %c0 = arith.constant 0 : index
    %c0_0 = arith.constant 0 : index
    %0 = vector.load %arg1[%c0, %c0_0] : memref<128x128xbf16, #tpu.memory_space<vmem>>, vector<128x128xbf16>
    %c0_1 = arith.constant 0 : index
    %c0_2 = arith.constant 0 : index
    %1 = vector.load %arg2[%c0_1, %c0_2] : memref<128x128xbf16, #tpu.memory_space<vmem>>, vector<128x128xbf16>
    %cst = arith.constant dense<0.000000e+00> : vector<128x128xf32>
    %2 = tpu.matmul %0, %1, %cst {dimension_numbers = #tpu.dot_dimension_numbers<[1], [0], [0], [1], [0, 0, 1, 1], [], []>} : vector<128x128xbf16>, vector<128x128xbf16>, vector<128x128xf32> -> vector<128x128xf32>
    %c0_3 = arith.constant 0 : index
    %c0_4 = arith.constant 0 : index
    %3 = vector.load %arg3[%c0_3, %c0_4] : memref<1x128xf32, #tpu.memory_space<vmem>>, vector<1x128xf32>
    %4 = vector.broadcast %3 : vector<1x128xf32> to vector<128x128xf32>
    %5 = arith.addf %2, %4 : vector<128x128xf32>
    %cst_5 = arith.constant 0.000000e+00 : f32
    %6 = vector.broadcast %cst_5 : f32 to vector<128x128xf32>
    %7 = arith.maximumf %5, %6 : vector<128x128xf32>
    %8 = arith.truncf %7 : vector<128x128xf32> to vector<128x128xbf16>
    %c0_6 = arith.constant 0 : index
    %c0_7 = arith.constant 0 : index
    %9 = vector.load %arg4[%c0_6, %c0_7] : memref<128x128xbf16, #tpu.memory_space<vmem>>, vector<128x128xbf16>
    %cst_8 = arith.constant dense<0.000000e+00> : vector<128x128xf32>
    %10 = tpu.matmul %8, %9, %cst_8 {dimension_numbers = #tpu.dot_dimension_numbers<[1], [0], [0], [1], [0, 0, 1, 1], [], []>} : vector<128x128xbf16>, vector<128x128xbf16>, vector<128x128xf32> -> vector<128x128xf32>
    %c0_9 = arith.constant 0 : index
    %c0_10 = arith.constant 0 : index
    %11 = vector.load %arg5[%c0_9, %c0_10] : memref<1x128xf32, #tpu.memory_space<vmem>>, vector<1x128xf32>
    %12 = vector.broadcast %11 : vector<1x128xf32> to vector<128x128xf32>
    %13 = arith.addf %10, %12 : vector<128x128xf32>
    %14 = vector.extract_strided_slice %13 {offsets = [0, 0], sizes = [128, 64], strides = [1, 1]} : vector<128x128xf32> to vector<128x64xf32>
    %15 = vector.extract_strided_slice %13 {offsets = [0, 64], sizes = [128, 64], strides = [1, 1]} : vector<128x128xf32> to vector<128x64xf32>
    %cst_11 = arith.constant 5.000000e-01 : f32
    %16 = vector.broadcast %cst_11 : f32 to vector<128x64xf32>
    %17 = arith.mulf %16, %15 : vector<128x64xf32>
    %18 = math.exp %17 : vector<128x64xf32>
    %c0_12 = arith.constant 0 : index
    %c0_13 = arith.constant 0 : index
    %19 = vector.load %arg6[%c0_12, %c0_13] : memref<128x64xf32, #tpu.memory_space<vmem>>, vector<128x64xf32>
    %20 = arith.mulf %18, %19 : vector<128x64xf32>
    %21 = arith.addf %14, %20 : vector<128x64xf32>
    %22 = arith.truncf %21 : vector<128x64xf32> to vector<128x64xbf16>
    %c0_14 = arith.constant 0 : index
    %c0_15 = arith.constant 0 : index
    %23 = vector.load %arg7[%c0_14, %c0_15] : memref<64x128xbf16, #tpu.memory_space<vmem>>, vector<64x128xbf16>
    %cst_16 = arith.constant dense<0.000000e+00> : vector<128x128xf32>
    %24 = tpu.matmul %22, %23, %cst_16 {dimension_numbers = #tpu.dot_dimension_numbers<[1], [0], [0], [1], [0, 0, 1, 1], [], []>} : vector<128x64xbf16>, vector<64x128xbf16>, vector<128x128xf32> -> vector<128x128xf32>
    %c0_17 = arith.constant 0 : index
    %c0_18 = arith.constant 0 : index
    %25 = vector.load %arg8[%c0_17, %c0_18] : memref<1x128xf32, #tpu.memory_space<vmem>>, vector<1x128xf32>
    %26 = vector.broadcast %25 : vector<1x128xf32> to vector<128x128xf32>
    %27 = arith.addf %24, %26 : vector<128x128xf32>
    %cst_19 = arith.constant 0.000000e+00 : f32
    %28 = vector.broadcast %cst_19 : f32 to vector<128x128xf32>
    %29 = arith.maximumf %27, %28 : vector<128x128xf32>
    %30 = arith.truncf %29 : vector<128x128xf32> to vector<128x128xbf16>
    %c0_20 = arith.constant 0 : index
    %c0_21 = arith.constant 0 : index
    %31 = vector.load %arg9[%c0_20, %c0_21] : memref<128x128xbf16, #tpu.memory_space<vmem>>, vector<128x128xbf16>
    %cst_22 = arith.constant dense<0.000000e+00> : vector<128x128xf32>
    %32 = tpu.matmul %30, %31, %cst_22 {dimension_numbers = #tpu.dot_dimension_numbers<[1], [0], [0], [1], [0, 0, 1, 1], [], []>} : vector<128x128xbf16>, vector<128x128xbf16>, vector<128x128xf32> -> vector<128x128xf32>
    %c0_23 = arith.constant 0 : index
    %c0_24 = arith.constant 0 : index
    %33 = vector.load %arg10[%c0_23, %c0_24] : memref<1x128xf32, #tpu.memory_space<vmem>>, vector<1x128xf32>
    %34 = vector.broadcast %33 : vector<1x128xf32> to vector<128x128xf32>
    %35 = arith.addf %32, %34 : vector<128x128xf32>
    %36 = arith.negf %35 : vector<128x128xf32>
    %37 = math.exp %36 : vector<128x128xf32>
    %cst_25 = arith.constant 1.000000e+00 : f32
    %38 = vector.broadcast %cst_25 : f32 to vector<128x128xf32>
    %39 = arith.addf %38, %37 : vector<128x128xf32>
    %40 = arith.divf %38, %39 : vector<128x128xf32>
    %c0_26 = arith.constant 0 : index
    %c0_27 = arith.constant 0 : index
    %41 = vector.load %arg11[%c0_26, %c0_27] : memref<128x128xf32, #tpu.memory_space<vmem>>, vector<128x128xf32>
    tpu.vector_store %arg11[%c0_26, %c0_27], %40 {strides = array<i32>} : memref<128x128xf32, #tpu.memory_space<vmem>>, vector<128x128xf32>,
    %c0_28 = arith.constant 0 : index
    %c0_29 = arith.constant 0 : index
    %42 = vector.load %arg12[%c0_28, %c0_29] : memref<128x128xf32, #tpu.memory_space<vmem>>, vector<128x128xf32>
    tpu.vector_store %arg12[%c0_28, %c0_29], %13 {strides = array<i32>} : memref<128x128xf32, #tpu.memory_space<vmem>>, vector<128x128xf32>,
    return
  }
  func.func @transform_0(%arg0: i32) -> (i32, i32) {
    %c0_i32 = arith.constant 0 : i32
    %c0_i32_0 = arith.constant 0 : i32
    return %arg0, %c0_i32 : i32, i32
  }
  func.func @transform_1(%arg0: i32) -> (i32, i32) {
    %c0_i32 = arith.constant 0 : i32
    %c0_i32_0 = arith.constant 0 : i32
    %c0_i32_1 = arith.constant 0 : i32
    return %c0_i32, %c0_i32_0 : i32, i32
  }
  func.func @transform_2(%arg0: i32) -> (i32, i32) {
    %c0_i32 = arith.constant 0 : i32
    %c0_i32_0 = arith.constant 0 : i32
    %c0_i32_1 = arith.constant 0 : i32
    return %c0_i32, %c0_i32_0 : i32, i32
  }
  func.func @transform_3(%arg0: i32) -> (i32, i32) {
    %c0_i32 = arith.constant 0 : i32
    %c0_i32_0 = arith.constant 0 : i32
    %c0_i32_1 = arith.constant 0 : i32
    return %c0_i32, %c0_i32_0 : i32, i32
  }
  func.func @transform_4(%arg0: i32) -> (i32, i32) {
    %c0_i32 = arith.constant 0 : i32
    %c0_i32_0 = arith.constant 0 : i32
    %c0_i32_1 = arith.constant 0 : i32
    return %c0_i32, %c0_i32_0 : i32, i32
  }
  func.func @transform_5(%arg0: i32) -> (i32, i32) {
    %c0_i32 = arith.constant 0 : i32
    %c0_i32_0 = arith.constant 0 : i32
    return %arg0, %c0_i32 : i32, i32
  }
  func.func @transform_6(%arg0: i32) -> (i32, i32) {
    %c0_i32 = arith.constant 0 : i32
    %c0_i32_0 = arith.constant 0 : i32
    %c0_i32_1 = arith.constant 0 : i32
    return %c0_i32, %c0_i32_0 : i32, i32
  }
  func.func @transform_7(%arg0: i32) -> (i32, i32) {
    %c0_i32 = arith.constant 0 : i32
    %c0_i32_0 = arith.constant 0 : i32
    %c0_i32_1 = arith.constant 0 : i32
    return %c0_i32, %c0_i32_0 : i32, i32
  }
  func.func @transform_8(%arg0: i32) -> (i32, i32) {
    %c0_i32 = arith.constant 0 : i32
    %c0_i32_0 = arith.constant 0 : i32
    %c0_i32_1 = arith.constant 0 : i32
    return %c0_i32, %c0_i32_0 : i32, i32
  }
  func.func @transform_9(%arg0: i32) -> (i32, i32) {
    %c0_i32 = arith.constant 0 : i32
    %c0_i32_0 = arith.constant 0 : i32
    %c0_i32_1 = arith.constant 0 : i32
    return %c0_i32, %c0_i32_0 : i32, i32
  }
  func.func @transform_10(%arg0: i32) -> (i32, i32) {
    %c0_i32 = arith.constant 0 : i32
    %c0_i32_0 = arith.constant 0 : i32
    return %arg0, %c0_i32 : i32, i32
  }
  func.func @transform_11(%arg0: i32) -> (i32, i32) {
    %c0_i32 = arith.constant 0 : i32
    %c0_i32_0 = arith.constant 0 : i32
    return %arg0, %c0_i32 : i32, i32
  }
}

</mosaic_0001>

<bundles_post_ra>
// kernel: vae_forward.1
= control target key start
LH: loop header
LB: loop body
LE: loop exit
PB: predicated region body
PF: predicated region fallthrough
CT: control target
= control target key end

     0   :  { %s2687_s0 = inlined_call_operand.vmem [shape: bf16[256,128], index: 0, kind: input, shape index: {}]   ;;  %s2688_s1 = inlined_call_operand.vmem [shape: bf16[128,128], index: 1, kind: input, shape index: {}]   ;;  %s2689_s2 = inlined_call_operand.vmem [shape: f32[1,128], index: 2, kind: input, shape index: {}]   ;;  %s2690_s3 = inlined_call_operand.vmem [shape: bf16[128,128], index: 3, kind: input, shape index: {}]   ;;  %s2691_s4 = inlined_call_operand.vmem [shape: f32[1,128], index: 4, kind: input, shape index: {}]   ;;  %s2692_s5 = inlined_call_operand.vmem [shape: f32[256,64], index: 5, kind: input, shape index: {}]   ;;  %s2693_s6 = inlined_call_operand.vmem [shape: bf16[64,128], index: 6, kind: input, shape index: {}]   ;;  %s2694_s7 = inlined_call_operand.vmem [shape: f32[1,128], index: 7, kind: input, shape index: {}]   ;;  %s2695_s8 = inlined_call_operand.vmem [shape: bf16[128,128], index: 8, kind: input, shape index: {}]   ;;  %s2696_s9 = inlined_call_operand.vmem [shape: f32[1,128], index: 9, kind: input, shape index: {}]   ;;  %s2697_s10 = inlined_call_operand.hbm [shape: f32[256,128], index: 10, kind: output, shape index: {0}]   ;;  %s2698_s11 = inlined_call_operand.vmem [shape: f32[256,128], index: 11, kind: output, shape index: {1}]  }
   0x1   :  { %2699 = sst [smem:[#allocation6_spill]] %s2687_s0 }
   0x2   :  { %17 = vsyncpa [#allocation3], 0 }
   0x3   :  { %19 = vsyncpa [#allocation3 + $0x1], 0  ;;  %s2247_s17 = smov 0   ;;  %s2249_s18 = smov 0  }
   0x4   :  { %s2251_s19 = smov 0   ;;  %s2253_s20 = smov 0  }
   0x5 LB: > { %s2268_s21 = sadd.s32 4294967295, %s2181_s20   ;;  %s1684_s22 = sadd.s32 4294967294, %s2181_s20   ;;  %s2181_s20 = sphi %s2253_s20, %s2708_s20   ;;  %s2177_s19 = sphi %s2251_s19, %s2707_s19   ;;  %s2173_s18 = sphi %s2249_s18, %s2706_s18   ;;  %s2169_s17 = sphi %s2247_s17, %s2705_s17  }
   0x6   : > { %s2272_s23 = sadd.s32 1, %s2181_s20   ;;  %s252_s24 = sadd.s32 1, %s2177_s19 }
   0x7   : > { %s249_s25 = ssub.s32 %s2181_s20, %s2272_s23  ;;  %p262_p0 = scmp.ne.s32.totalorder %s2177_s19, %s2173_s18 }
   0x8   : > { %p250_p1 = scmp.eq.s32.totalorder %s249_s25, 0  ;;  %p263_p2 = scmp.eq.s32.totalorder %s2268_s21, 1 }
   0x9   : > { %p268_p3 = scmp.ne.s32.totalorder %s2173_s18, %s2169_s17  ;;  %p269_p4 = scmp.eq.s32.totalorder %s1684_s22, 1 }
   0xa   : > { %s2283_s26 = scalar_select %p250_p1, %s2177_s19, %s252_s24  }
   0xb   : > { %p2285_p5 = por %p263_p2, %p262_p0  ;;  %p2289_p6 = por %p269_p4, %p268_p3 }
   0xc   : > { %2700 = sst [smem:[#allocation5_spill]] %s2283_s26  ;;  %p1687_p7 = scmp.ge.s32.totalorder %s2181_s20, 1 }
   0xd   : > { %p355_p8 = scmp.lt.s32.totalorder %s2181_s20, 3 }
   0xf   : > { %p356_p9 = pnand %p1687_p7, %p355_p8 }
  0x10   : > { %v1987_v0 = vld [vmem:[%s2688_s1] sm:$0xff] (!%p356_p9)   ;;  %s1689_s12 = sshll.u32 (!%p356_p9), %s2268_s21, 4  ;;  %v1988_v1 = vld [vmem:[%s2688_s1 + $0x8] sm:$0xff] (!%p356_p9)   ;;  %v1989_v2 = vld [vmem:[%s2688_s1 + $0x10] sm:$0xff] (!%p356_p9)   ;;  %s2703_s0 = sld [smem:[#allocation6_spill]] (!%p356_p9)  ;;  %vm1120_vm0 = vcmask (!%p356_p9), 523264  }
  0x11   : > { %359 = sbr.rel (%p356_p9) target bundleno = 1133 (0x46d), region = 60  ;;  %p406_p10 = scmp.lt.s32.totalorder (!%p356_p9), %s1689_s12, 31  ;;  %1825 = vmatprep.subr.bf16.mxu0 (!%p356_p9), %v1987_v0  ;;  %v1990_v3 = vld [vmem:[%s2688_s1 + $0x18] sm:$0xff] (!%p356_p9)   ;;  %v1991_v5 = vld [vmem:[%s2688_s1 + $0x20] sm:$0xff] (!%p356_p9)   ;;  %v1992_v6 = vld [vmem:[%s2688_s1 + $0x28] sm:$0xff] (!%p356_p9)  }
  0x12   : > { %1826 = vmatpush3.bf16.msra.mxu0 (!%p356_p9), %v1987_v0  ;;  %v2003_v7 = vld [vmem:[%s2690_s3] sm:$0xff] (!%p356_p9)   ;;  %v2004_v8 = vld [vmem:[%s2690_s3 + $0x8] sm:$0xff] (!%p356_p9)   ;;  %v1993_v9 = vld [vmem:[%s2688_s1 + $0x30] sm:$0xff] (!%p356_p9)   ;;  %s1764_s16 = sshll.u32 (!%p356_p9), %s2268_s21, 11  ;;  %s2184_s30 = smov (!%p356_p9), [#allocation2]  }
  0x13   : > { %1827 = vmatprep.subr.bf16.mxu0 (!%p356_p9), %v1988_v1  ;;  %1857 = vmatprep.subr.bf16.mxu1 (!%p356_p9), %v2003_v7  ;;  %v2005_v10 = vld [vmem:[%s2690_s3 + $0x10] sm:$0xff] (!%p356_p9)   ;;  %v1994_v11 = vld [vmem:[%s2688_s1 + $0x38] sm:$0xff] (!%p356_p9)   ;;  %v2007_v13 = vld [vmem:[%s2690_s3 + $0x20] sm:$0xff] (!%p356_p9)   ;;  %s2123_s13 = sshll.u32 (!%p356_p9), %s2184_s30, 4  ;;  %s2124_s13 = int_to_ptr.vmem [resolvable:$false] %s2123_s13 }
  0x14   : > { %1858 = vmatpush3.bf16.msra.mxu1 (!%p356_p9), %v2003_v7  ;;  %v2006_v12 = vld [vmem:[%s2690_s3 + $0x18] sm:$0xff] (!%p356_p9)   ;;  %v2008_v16 = vld [vmem:[%s2690_s3 + $0x28] sm:$0xff] (!%p356_p9)   ;;  %v2009_v22 = vld [vmem:[%s2690_s3 + $0x30] sm:$0xff] (!%p356_p9)   ;;  %s2125_s14 = scalar_lea.vmem (!%p356_p9), %s2124_s13, 4096 }
  0x15   : > { %1859 = vmatprep.subr.bf16.mxu1 (!%p356_p9), %v2004_v8  ;;  %v2010_v23 = vld [vmem:[%s2690_s3 + $0x38] sm:$0xff] (!%p356_p9)   ;;  %v1695_v40 = vld [vmem:[%s2689_s2] ss:$0 sm:$0xff] (!%p356_p9) }
  0x16   : > { %1828 = vmatpush3.bf16.msra.mxu0 (!%p356_p9), %v1988_v1 }
  0x17   : > { %1829 = vmatprep.subr.bf16.mxu0 (!%p356_p9), %v1989_v2 }
  0x18   : > { %s2710_s12 = smov (!%p406_p10, %s1689_s12), 31  ;;  %1860 = vmatpush3.bf16.msra.mxu1 %v2004_v8 }
  0x19   : > { %s1690_s22 = sshll.u32 %s2710_s12, 2  ;;  %1861 = vmatprep.subr.bf16.mxu1 %v2005_v10 }
  0x1a   : > { %s2311_s29 = scalar_lea.vmem %s2703_s0, %s1690_s22  ;;  %1830 = vmatpush3.bf16.msra.mxu0 %v1989_v2  ;;  %s1692_s22 = sshll.u32 %s2710_s12, 3 }
  0x1b   : > { %v1995_v4 = vld [vmem:[%s2311_s29] sm:$0xff]   ;;  %1831 = vmatprep.subr.bf16.mxu0 %v1990_v3  ;;  %v1996_v14 = vld [vmem:[%s2311_s29 + $0x8] sm:$0xff]   ;;  %v1997_v15 = vld [vmem:[%s2311_s29 + $0x10] sm:$0xff]   ;;  %s2366_s26 = scalar_lea.vmem %s2692_s5, %s1692_s22  ;;  %s2422_s15 = scalar_lea.vmem %s2698_s11, %s1692_s22 }
  0x1c   : > { %1841 = vmatprep.mubr.bf16.mxu0 %v1995_v4  ;;  %1862 = vmatpush3.bf16.msra.mxu1 %v2005_v10  ;;  %v1998_v17 = vld [vmem:[%s2311_s29 + $0x18] sm:$0xff]   ;;  %v1999_v18 = vld [vmem:[%s2311_s29 + $0x20] sm:$0xff]   ;;  %v2000_v19 = vld [vmem:[%s2311_s29 + $0x28] sm:$0xff]   ;;  %s2637_s0 = scalar_lea.hbm %s2697_s10, %s1764_s16 }
  0x1d   : > { %1863 = vmatprep.subr.bf16.mxu1 %v2006_v12  ;;  %v2001_v20 = vld [vmem:[%s2311_s29 + $0x30] sm:$0xff]   ;;  %v2002_v21 = vld [vmem:[%s2311_s29 + $0x38] sm:$0xff]   ;;  %v897_v24 = vld [vmem:[%s2366_s26] sm:$0xff]  ;;  %s2183_s29 = smov 64  }
  0x1e   : > { %1832 = vmatpush3.bf16.msra.mxu0 %v1990_v3  ;;  %v899_v25 = vld [vmem:[%s2366_s26 + $0x10] sm:$0xff]  ;;  %929 = vrot.lane.b32.xlu0 %v897_v24, %s2183_s29  ;;  %v898_v26 = vld [vmem:[%s2366_s26 + $0x8] sm:$0xff]  ;;  %v900_v27 = vld [vmem:[%s2366_s26 + $0x18] sm:$0xff] }
  0x1f   : > { %1833 = vmatprep.subr.bf16.mxu0 %v1991_v5  ;;  %933 = vrot.lane.b32.xlu1 %v899_v25, %s2183_s29  ;;  %v901_v28 = vld [vmem:[%s2366_s26 + $0x20] sm:$0xff]  ;;  %v902_v29 = vld [vmem:[%s2366_s26 + $0x28] sm:$0xff]  ;;  %v903_v30 = vld [vmem:[%s2366_s26 + $0x30] sm:$0xff] }
  0x20   : > { %1864 = vmatpush3.bf16.msra.mxu1 %v2006_v12  ;;  %v904_v31 = vld [vmem:[%s2366_s26 + $0x38] sm:$0xff]  ;;  %v905_v32 = vld [vmem:[%s2366_s26 + $0x40] sm:$0xff]  ;;  %v906_v33 = vld [vmem:[%s2366_s26 + $0x48] sm:$0xff] }
  0x21   : > { %1865 = vmatprep.subr.bf16.mxu1 %v2007_v13  ;;  %v907_v34 = vld [vmem:[%s2366_s26 + $0x50] sm:$0xff]  ;;  %v908_v35 = vld [vmem:[%s2366_s26 + $0x58] sm:$0xff]  ;;  %v909_v36 = vld [vmem:[%s2366_s26 + $0x60] sm:$0xff] }
  0x22   : > { %1834 = vmatpush3.bf16.msra.mxu0 %v1991_v5  ;;  %931 = vrot.lane.b32.xlu0 %v898_v26, %s2183_s29  ;;  %v910_v37 = vld [vmem:[%s2366_s26 + $0x68] sm:$0xff]  ;;  %v911_v38 = vld [vmem:[%s2366_s26 + $0x70] sm:$0xff]  ;;  %v912_v39 = vld [vmem:[%s2366_s26 + $0x78] sm:$0xff] }
  0x23   : > { %1835 = vmatprep.subr.bf16.mxu0 %v1992_v6  ;;  %935 = vrot.lane.b32.xlu1 %v900_v27, %s2183_s29 }
  0x24   : > { %1866 = vmatpush3.bf16.msra.mxu1 %v2007_v13 }
  0x25   : > { %1867 = vmatprep.subr.bf16.mxu1 %v2008_v16 }
  0x26   : > { %1836 = vmatpush3.bf16.msra.mxu0 %v1992_v6  ;;  %937 = vrot.lane.b32.xlu0 %v901_v28, %s2183_s29 }
  0x27   : > { %1837 = vmatprep.subr.bf16.mxu0 %v1993_v9  ;;  %939 = vrot.lane.b32.xlu1 %v902_v29, %s2183_s29 }
  0x28   : > { %1868 = vmatpush3.bf16.msra.mxu1 %v2008_v16 }
  0x29   : > { %1869 = vmatprep.subr.bf16.mxu1 %v2009_v22 }
  0x2a   : > { %1838 = vmatpush3.bf16.msra.mxu0 %v1993_v9  ;;  %941 = vrot.lane.b32.xlu0 %v903_v30, %s2183_s29 }
  0x2b   : > { %1839 = vmatprep.subr.bf16.mxu0 %v1994_v11  ;;  %943 = vrot.lane.b32.xlu1 %v904_v31, %s2183_s29 }
  0x2c   : > { %1870 = vmatpush3.bf16.msra.mxu1 %v2009_v22 }
  0x2d   : > { %1871 = vmatprep.subr.bf16.mxu1 %v2010_v23 }
  0x2e   : > { %1840 = vmatpush3.bf16.msra.mxu0 %v1994_v11  ;;  %945 = vrot.lane.b32.xlu0 %v905_v32, %s2183_s29 }
  0x2f   : > { %947 = vrot.lane.b32.xlu1 %v906_v33, %s2183_s29  ;;  %v2011_v33 = vld [vmem:[%s2693_s6] sm:$0xff]  }
  0x30   : > { %1872 = vmatpush3.bf16.msra.mxu1 %v2010_v23  ;;  %1889 = vmatprep.subr.bf16.mxu0 %v2011_v33 }
  0x31   : > { %1842 = vmatmul.mubr.bf16.vlgmr.msra.gmra.mrb[0].mxu0 %v1996_v14 }
  0x32   : > { %1845 = vmatprep.mubr.bf16.mxu0 %v1997_v15  ;;  %949 = vrot.lane.b32.xlu0 %v907_v34, %s2183_s29  ;;  %v2012_v34 = vld [vmem:[%s2693_s6 + $0x8] sm:$0xff]  }
  0x33   : > { %951 = vrot.lane.b32.xlu1 %v908_v35, %s2183_s29  ;;  %1890 = vmatpush3.bf16.msra.mxu0 %v2011_v33  ;;  %v2013_v35 = vld [vmem:[%s2693_s6 + $0x10] sm:$0xff]  }
  0x34   : > { %1891 = vmatprep.subr.bf16.mxu0 %v2012_v34 }
  0x36   : > { %953 = vrot.lane.b32.xlu0 %v909_v36, %s2183_s29  ;;  %v2415_v36 = vld [vmem:[%s2691_s4] ss:$0 sm:$0xff] }
  0x37   : > { %955 = vrot.lane.b32.xlu1 %v910_v37, %s2183_s29  ;;  %1892 = vmatpush3.bf16.msra.mxu0 %v2012_v34 }
  0x38   : > { %1893 = vmatprep.subr.bf16.mxu0 %v2013_v35 }
  0x39   : > { %1846 = vmatmul.mubr.bf16.gmra.mrb[4].mxu0 %v1998_v17 }
  0x3a   : > { %1849 = vmatprep.mubr.bf16.mxu0 %v1999_v18  ;;  %957 = vrot.lane.b32.xlu0 %v911_v38, %s2183_s29 }
  0x3b   : > { %959 = vrot.lane.b32.xlu1 %v912_v39, %s2183_s29  ;;  %1894 = vmatpush3.bf16.msra.mxu0 %v2013_v35 }
  0x41   : > { %1850 = vmatmul.mubr.bf16.gmra.mrb[8].mxu0 %v2000_v19 }
  0x42   : > { %1853 = vmatprep.mubr.bf16.mxu0 %v2001_v20 }
  0x49   : > { %1854 = vmatmul.mubr.bf16.gmra.mrb[12].mxu0 %v2002_v21 }
 0x104   : > { %v1843_v41 = vpop.f32.mrb[0].mxu0 }
 0x105   : > { %v603_v42 = vadd.f32 %v1843_v41, %v1695_v40  ;;  %v594_v43 = vpop.f32.mrb[1].mxu0 }
 0x106   : > { %v595_v44 = vadd.f32 %v1695_v40, %v594_v43  ;;  %v1844_v45 = vpop.f32.mrb[2].mxu0 }
 0x107   : > { %v606_v46 = vadd.f32 %v1844_v45, %v1695_v40  ;;  %v597_v47 = vpop.f32.mrb[3].mxu0  ;;  %v659_v49 = vmax.f32 %v603_v42, 0.0  ;;  %v930_v42 = vpop.permute.xlu0 %929 }
 0x108   : > { %v598_v48 = vadd.f32 %v1695_v40, %v597_v47  ;;  %v657_v51 = vmax.f32 %v595_v44, 0.0 }
 0x109   : > { %v660_v50 = vmax.f32 %v606_v46, 0.0 }
 0x10a   : > { %v658_v52 = vmax.f32 %v598_v48, 0.0  ;;  %v2442_v48 = vpop.permute.xlu1 %933 }
 0x10b   : > { %v674_v53 = vpack.c.bf16 %v660_v50, %v659_v49 }
 0x10c   : > { %v1847_v54 = vpop.f32.mrb[4].mxu0  ;;  %v673_v55 = vpack.c.bf16 %v658_v52, %v657_v51 }
 0x10d   : > { %v619_v56 = vadd.f32 %v1847_v54, %v1695_v40  ;;  %v610_v57 = vpop.f32.mrb[5].mxu0 }
 0x10e   : > { %v611_v58 = vadd.f32 %v1695_v40, %v610_v57  ;;  %v1848_v59 = vpop.f32.mrb[6].mxu0  ;;  %1873 = vmatprep.mubr.bf16.mxu1 %v673_v55  ;;  %v2014_v57 = vld [vmem:[%s2693_s6 + $0x18] sm:$0xff]  }
 0x10f   : > { %v622_v60 = vadd.f32 %v1848_v59, %v1695_v40  ;;  %v613_v61 = vpop.f32.mrb[7].mxu0  ;;  %1874 = vmatmul.mubr.bf16.vlgmr.msra.gmra.mrb[0].mxu1 %v674_v53  ;;  %v663_v63 = vmax.f32 %v619_v56, 0.0  ;;  %v932_v56 = vpop.permute.xlu0 %931  ;;  %1895 = vmatprep.subr.bf16.mxu0 %v2014_v57 }
 0x110   : > { %v614_v62 = vadd.f32 %v1695_v40, %v613_v61  ;;  %v661_v1 = vmax.f32 %v611_v58, 0.0  ;;  %1896 = vmatpush3.bf16.msra.mxu0 %v2014_v57 }
 0x111   : > { %v664_v0 = vmax.f32 %v622_v60, 0.0 }
 0x112   : > { %v662_v2 = vmax.f32 %v614_v62, 0.0  ;;  %v936_v62 = vpop.permute.xlu1 %935 }
 0x113   : > { %v676_v3 = vpack.c.bf16 %v664_v0, %v663_v63 }
 0x114   : > { %v675_v4 = vpack.c.bf16 %v662_v2, %v661_v1  ;;  %v1851_v5 = vpop.f32.mrb[8].mxu0 }
 0x115   : > { %v635_v6 = vadd.f32 %v1851_v5, %v1695_v40  ;;  %v626_v7 = vpop.f32.mrb[9].mxu0 }
 0x116   : > { %v627_v8 = vadd.f32 %v1695_v40, %v626_v7  ;;  %v1852_v9 = vpop.f32.mrb[10].mxu0  ;;  %1877 = vmatprep.mubr.bf16.mxu1 %v675_v4 }
 0x117   : > { %v638_v10 = vadd.f32 %v1852_v9, %v1695_v40  ;;  %v629_v11 = vpop.f32.mrb[11].mxu0  ;;  %1878 = vmatmul.mubr.bf16.gmra.mrb[4].mxu1 %v676_v3  ;;  %v667_v13 = vmax.f32 %v635_v6, 0.0 }
 0x118   : > { %v630_v12 = vadd.f32 %v1695_v40, %v629_v11  ;;  %v665_v15 = vmax.f32 %v627_v8, 0.0  ;;  %v938_v8 = vpop.permute.xlu0 %937 }
 0x119   : > { %v668_v14 = vmax.f32 %v638_v10, 0.0 }
 0x11a   : > { %v666_v16 = vmax.f32 %v630_v12, 0.0  ;;  %v940_v12 = vpop.permute.xlu1 %939 }
 0x11b   : > { %v678_v17 = vpack.c.bf16 %v668_v14, %v667_v13 }
 0x11c   : > { %v677_v18 = vpack.c.bf16 %v666_v16, %v665_v15  ;;  %v1855_v19 = vpop.f32.mrb[12].mxu0 }
 0x11d   : > { %v651_v20 = vadd.f32 %v1855_v19, %v1695_v40  ;;  %v642_v21 = vpop.f32.mrb[13].mxu0 }
 0x11e   : > { %v643_v22 = vadd.f32 %v1695_v40, %v642_v21  ;;  %v1856_v23 = vpop.f32.mrb[14].mxu0  ;;  %1881 = vmatprep.mubr.bf16.mxu1 %v677_v18  ;;  %v944_v33 = vpop.permute.xlu1 %943 }
 0x11f   : > { %v654_v24 = vadd.f32 %v1856_v23, %v1695_v40  ;;  %v645_v25 = vpop.f32.mrb[15].mxu0  ;;  %1882 = vmatmul.mubr.bf16.gmra.mrb[8].mxu1 %v678_v17  ;;  %v671_v27 = vmax.f32 %v651_v20, 0.0 }
 0x120   : > { %v646_v26 = vadd.f32 %v1695_v40, %v645_v25  ;;  %v669_v29 = vmax.f32 %v643_v22, 0.0 }
 0x121   : > { %v672_v28 = vmax.f32 %v654_v24, 0.0 }
 0x122   : > { %v670_v30 = vmax.f32 %v646_v26, 0.0  ;;  %v942_v26 = vpop.permute.xlu0 %941 }
 0x123   : > { %v680_v31 = vpack.c.bf16 %v672_v28, %v671_v27 }
 0x124   : > { %v679_v32 = vpack.c.bf16 %v670_v30, %v669_v29 }
 0x126   : > { %1885 = vmatprep.mubr.bf16.mxu1 %v679_v32 }
 0x127   : > { %1886 = vmatmul.mubr.bf16.gmra.mrb[12].mxu1 %v680_v31 }
 0x1e2   : > { %v1875_v37 = vpop.f32.mrb[0].mxu1 }
 0x1e3   : > { %v2425_v38 = vadd.f32 %v1875_v37, %v2415_v36  ;;  %v786_v39 = vpop.f32.mrb[1].mxu1 }
 0x1e4   : > { %v2428_v40 = vadd.f32 %v2415_v36, %v786_v39  ;;  %v1876_v41 = vpop.f32.mrb[2].mxu1 }
 0x1e5   : > { %v851_v43 = vmul.f32 0.5, %v2425_v38  ;;  %1548 = vst [vmem:[%s2422_s15 + $0x10] sm:$0xff] %v2425_v38  ;;  %v2434_v44 = vadd.f32 %v1876_v41, %v2415_v36  ;;  %v789_v45 = vpop.f32.mrb[3].mxu1 }
 0x1e6   : > { %v849_v46 = vmul.f32 0.5, %v2428_v40  ;;  %1546 = vst [vmem:[%s2422_s15] sm:$0xff] %v2428_v40  ;;  %v2440_v47 = vadd.f32 %v2415_v36, %v789_v45 }
 0x1e7   : > { %v869_v49 = vmul.f32 1.442695, %v851_v43  ;;  %v852_v50 = vmul.f32 0.5, %v2434_v44  ;;  %1549 = vst [vmem:[%s2422_s15 + $0x18] sm:$0xff] %v2434_v44 }
 0x1e8   : > { %v865_v51 = vmul.f32 1.442695, %v849_v46  ;;  %v850_v52 = vmul.f32 0.5, %v2440_v47  ;;  %1547 = vst [vmem:[%s2422_s15 + $0x8] sm:$0xff] %v2440_v47 }
 0x1e9   : > { %v871_v53 = vmul.f32 1.442695, %v852_v50 }
 0x1ea   : > { %2023 = vpow2.f32 %v865_v51  ;;  %v867_v54 = vmul.f32 1.442695, %v850_v52  ;;  %v1879_v55 = vpop.f32.mrb[4].mxu1 }
 0x1eb   : > { %2025 = vpow2.f32 %v869_v49  ;;  %v2454_v58 = vadd.f32 %v1879_v55, %v2415_v36  ;;  %v802_v59 = vpop.f32.mrb[5].mxu1  ;;  %v946_v49 = vpop.permute.xlu0 %945 }
 0x1ec   : > { %2027 = vpow2.f32 %v867_v54  ;;  %v2457_v60 = vadd.f32 %v2415_v36, %v802_v59  ;;  %v1880_v61 = vpop.f32.mrb[6].mxu1  ;;  %v948_v59 = vpop.permute.xlu1 %947 }
 0x1ed   : > { %v855_v63 = vmul.f32 0.5, %v2454_v58  ;;  %1552 = vst [vmem:[%s2422_s15 + $0x30] sm:$0xff] %v2454_v58  ;;  %v2463_v0 = vadd.f32 %v1880_v61, %v2415_v36  ;;  %v805_v1 = vpop.f32.mrb[7].mxu1  ;;  %2029 = vpow2.f32 %v871_v53 }
 0x1ee   : > { %v853_v2 = vmul.f32 0.5, %v2457_v60  ;;  %1550 = vst [vmem:[%s2422_s15 + $0x20] sm:$0xff] %v2457_v60  ;;  %v2469_v3 = vadd.f32 %v2415_v36, %v805_v1 }
 0x1ef   : > { %v877_v4 = vmul.f32 1.442695, %v855_v63  ;;  %v856_v5 = vmul.f32 0.5, %v2463_v0  ;;  %1553 = vst [vmem:[%s2422_s15 + $0x38] sm:$0xff] %v2463_v0 }
 0x1f0   : > { %v873_v6 = vmul.f32 1.442695, %v853_v2  ;;  %v854_v7 = vmul.f32 0.5, %v2469_v3  ;;  %1551 = vst [vmem:[%s2422_s15 + $0x28] sm:$0xff] %v2469_v3 }
 0x1f1   : > { %v879_v9 = vmul.f32 1.442695, %v856_v5 }
 0x1f2   : > { %2031 = vpow2.f32 %v873_v6  ;;  %v875_v10 = vmul.f32 1.442695, %v854_v7  ;;  %v1883_v11 = vpop.f32.mrb[8].mxu1  ;;  %v950_v7 = vpop.permute.xlu0 %949 }
 0x1f3   : > { %2033 = vpow2.f32 %v877_v4  ;;  %v2478_v13 = vadd.f32 %v1883_v11, %v2415_v36  ;;  %v818_v14 = vpop.f32.mrb[9].mxu1 }
 0x1f4   : > { %v2024_v15 = vpop.eup %2023  ;;  %2035 = vpow2.f32 %v875_v10  ;;  %v2481_v16 = vadd.f32 %v2415_v36, %v818_v14  ;;  %v1884_v17 = vpop.f32.mrb[10].mxu1 }
 0x1f5   : > { %v2026_v18 = vpop.eup %2025  ;;  %v977_v19 = vmul.f32 %v2024_v15, %v930_v42  ;;  %v859_v20 = vmul.f32 0.5, %v2478_v13  ;;  %1556 = vst [vmem:[%s2422_s15 + $0x50] sm:$0xff] %v2478_v13  ;;  %v2487_v21 = vadd.f32 %v1884_v17, %v2415_v36  ;;  %v821_v22 = vpop.f32.mrb[11].mxu1  ;;  %2037 = vpow2.f32 %v879_v9 }
 0x1f6   : > { %v2028_v23 = vpop.eup %2027  ;;  %v857_v24 = vmul.f32 0.5, %v2481_v16  ;;  %1554 = vst [vmem:[%s2422_s15 + $0x40] sm:$0xff] %v2481_v16  ;;  %v2493_v25 = vadd.f32 %v2415_v36, %v821_v22  ;;  %v979_v34 = vmul.f32 %v2026_v18, %v2442_v48  ;;  %v952_v10 = vpop.permute.xlu1 %951 }
 0x1f7   : > { %v885_v27 = vmul.f32 1.442695, %v859_v20  ;;  %v978_v28 = vmul.f32 %v2028_v23, %v932_v56  ;;  %v860_v29 = vmul.f32 0.5, %v2487_v21  ;;  %1557 = vst [vmem:[%s2422_s15 + $0x58] sm:$0xff] %v2487_v21  ;;  %1009 = vrot.lane.b32.xlu0 %v977_v19, %s2183_s29  ;;  %v2030_v30 = vpop.eup %2029  ;;  %v954_v18 = vpop.permute.xlu0 %953 }
 0x1f8   : > { %v881_v31 = vmul.f32 1.442695, %v857_v24  ;;  %v858_v32 = vmul.f32 0.5, %v2493_v25  ;;  %1555 = vst [vmem:[%s2422_s15 + $0x48] sm:$0xff] %v2493_v25  ;;  %v980_v41 = vmul.f32 %v2030_v30, %v936_v62  ;;  %v2015_v24 = vld [vmem:[%s2695_s8] sm:$0xff]  }
 0x1f9   : > { %1011 = vrot.lane.b32.xlu1 %v978_v28, %s2183_s29  ;;  %v887_v35 = vmul.f32 1.442695, %v860_v29  ;;  %1913 = vmatprep.subr.bf16.mxu1 %v2015_v24 }
 0x1fa   : > { %2039 = vpow2.f32 %v881_v31  ;;  %v883_v37 = vmul.f32 1.442695, %v858_v32  ;;  %v1887_v39 = vpop.f32.mrb[12].mxu1  ;;  %v956_v20 = vpop.permute.xlu1 %955  ;;  %1914 = vmatpush3.bf16.msra.mxu1 %v2015_v24 }
 0x1fb   : > { %2041 = vpow2.f32 %v885_v27  ;;  %v2505_v42 = vadd.f32 %v1887_v39, %v2415_v36  ;;  %v834_v43 = vpop.f32.mrb[13].mxu1  ;;  %1013 = vrot.lane.b32.xlu0 %v979_v34, %s2183_s29  ;;  %v958_v30 = vpop.permute.xlu0 %957  ;;  %v2017_v34 = vld [vmem:[%s2695_s8 + $0x10] sm:$0xff]   ;;  %v2018_v39 = vld [vmem:[%s2695_s8 + $0x18] sm:$0xff]  }
 0x1fc   : > { %v2032_v45 = vpop.eup %2031  ;;  %2043 = vpow2.f32 %v883_v37  ;;  %v2509_v46 = vadd.f32 %v2415_v36, %v834_v43  ;;  %v1888_v48 = vpop.f32.mrb[14].mxu1  ;;  %v2020_v43 = vld [vmem:[%s2695_s8 + $0x28] sm:$0xff]  }
 0x1fd   : > { %v2034_v50 = vpop.eup %2033  ;;  %v981_v51 = vmul.f32 %v2032_v45, %v938_v8  ;;  %v863_v52 = vmul.f32 0.5, %v2505_v42  ;;  %1560 = vst [vmem:[%s2422_s15 + $0x70] sm:$0xff] %v2505_v42  ;;  %v2515_v53 = vadd.f32 %v1888_v48, %v2415_v36  ;;  %v837_v54 = vpop.f32.mrb[15].mxu1  ;;  %1015 = vrot.lane.b32.xlu1 %v980_v41, %s2183_s29  ;;  %2045 = vpow2.f32 %v887_v35  ;;  %v2019_v41 = vld [vmem:[%s2695_s8 + $0x20] sm:$0xff]  }
 0x1fe   : > { %v2036_v55 = vpop.eup %2035  ;;  %v861_v56 = vmul.f32 0.5, %v2509_v46  ;;  %1558 = vst [vmem:[%s2422_s15 + $0x60] sm:$0xff] %v2509_v46  ;;  %v2522_v57 = vadd.f32 %v2415_v36, %v837_v54  ;;  %v983_v5 = vmul.f32 %v2034_v50, %v942_v26  ;;  %v2016_v26 = vld [vmem:[%s2695_s8 + $0x8] sm:$0xff]  }
 0x1ff   : > { %v982_v61 = vmul.f32 %v2036_v55, %v940_v12  ;;  %v893_v62 = vmul.f32 1.442695, %v863_v52  ;;  %v864_v63 = vmul.f32 0.5, %v2515_v53  ;;  %1561 = vst [vmem:[%s2422_s15 + $0x78] sm:$0xff] %v2515_v53  ;;  %1017 = vrot.lane.b32.xlu0 %v981_v51, %s2183_s29  ;;  %v2038_v1 = vpop.eup %2037  ;;  %1915 = vmatprep.subr.bf16.mxu1 %v2016_v26 }
 0x200   : > { %v889_v2 = vmul.f32 1.442695, %v861_v56  ;;  %v862_v4 = vmul.f32 0.5, %v2522_v57  ;;  %1559 = vst [vmem:[%s2422_s15 + $0x68] sm:$0xff] %v2522_v57  ;;  %v984_v8 = vmul.f32 %v2038_v1, %v944_v33  ;;  %v960_v33 = vpop.permute.xlu1 %959  ;;  %1916 = vmatpush3.bf16.msra.mxu1 %v2016_v26  ;;  %s395_s15 = sand.u32 1, %s2173_s18  }
 0x201   : > { %1019 = vrot.lane.b32.xlu1 %v982_v61, %s2183_s29  ;;  %v895_v36 = vmul.f32 1.442695, %v864_v63  ;;  %1917 = vmatprep.subr.bf16.mxu1 %v2017_v34  ;;  %s1688_s12 = sshll.u32 %s395_s15, 7  ;;  %s2646_s21 = scalar_lea.sflag [#allocation3], %s395_s15 }
 0x202   : > { %2047 = vpow2.f32 %v889_v2  ;;  %v891_v6 = vmul.f32 1.442695, %v862_v4  ;;  %s2617_s22 = scalar_lea.vmem [#allocation2], %s1688_s12 }
 0x203   : > { %2049 = vpow2.f32 %v893_v62  ;;  %1021 = vrot.lane.b32.xlu0 %v983_v5, %s2183_s29 }
 0x204   : > { %v2040_v9 = vpop.eup %2039  ;;  %2051 = vpow2.f32 %v891_v6  ;;  %1918 = vmatpush3.bf16.msra.mxu1 %v2017_v34 }
 0x205   : > { %v2042_v11 = vpop.eup %2041  ;;  %v985_v12 = vmul.f32 %v2040_v9, %v946_v49  ;;  %1023 = vrot.lane.b32.xlu1 %v984_v8, %s2183_s29  ;;  %2053 = vpow2.f32 %v895_v36  ;;  %1919 = vmatprep.subr.bf16.mxu1 %v2018_v39 }
 0x206   : > { %v2044_v14 = vpop.eup %2043  ;;  %v987_v19 = vmul.f32 %v2042_v11, %v950_v7 }
 0x207   : > { %v986_v15 = vmul.f32 %v2044_v14, %v948_v59  ;;  %1025 = vrot.lane.b32.xlu0 %v985_v12, %s2183_s29  ;;  %v2046_v17 = vpop.eup %2045 }
 0x208   : > { %v988_v22 = vmul.f32 %v2046_v17, %v952_v10  ;;  %1920 = vmatpush3.bf16.msra.mxu1 %v2018_v39 }
 0x209   : > { %1027 = vrot.lane.b32.xlu1 %v986_v15, %s2183_s29  ;;  %1921 = vmatprep.subr.bf16.mxu1 %v2019_v41 }
 0x20b   : > { %1029 = vrot.lane.b32.xlu0 %v987_v19, %s2183_s29 }
 0x20c   : > { %v2048_v23 = vpop.eup %2047  ;;  %1922 = vmatpush3.bf16.msra.mxu1 %v2019_v41 }
 0x20d   : > { %v2050_v27 = vpop.eup %2049  ;;  %v989_v28 = vmul.f32 %v2048_v23, %v954_v18  ;;  %1031 = vrot.lane.b32.xlu1 %v988_v22, %s2183_s29  ;;  %1923 = vmatprep.subr.bf16.mxu1 %v2020_v43 }
 0x20e   : > { %v2052_v29 = vpop.eup %2051  ;;  %v991_v35 = vmul.f32 %v2050_v27, %v958_v30 }
 0x20f   : > { %v990_v31 = vmul.f32 %v2052_v29, %v956_v20  ;;  %1033 = vrot.lane.b32.xlu0 %v989_v28, %s2183_s29  ;;  %v2054_v32 = vpop.eup %2053 }
 0x210   : > { %v992_v37 = vmul.f32 %v2054_v32, %v960_v33  ;;  %1924 = vmatpush3.bf16.msra.mxu1 %v2020_v43 }
 0x211   : > { %1035 = vrot.lane.b32.xlu1 %v990_v31, %s2183_s29 }
 0x213   : > { %1037 = vrot.lane.b32.xlu0 %v991_v35, %s2183_s29 }
 0x215   : > { %1039 = vrot.lane.b32.xlu1 %v992_v37, %s2183_s29  ;;  %s1581_s29 = sshll.u32 %s2617_s22, 4  ;;  %s2639_s29 = int_to_ptr.vmem [resolvable:$true] %s1581_s29 }
 0x216   : > { %s2119_s26 = scalar_lea.vmem %s2639_s29, 2048  ;;  %p2126_p0 = scmp.lt.s32.totalorder %s2639_s29, %s2124_s13 }
 0x217   : > { %p2120_p11 = scmp.ne.s32.totalorder %s2639_s29, %s2119_s26  ;;  %p2127_p1 = scmp.lt.s32.totalorder %s2125_s14, %s2119_s26 }
 0x219   : > { %p2121_p12 = pnand %p2120_p11, %p2285_p5  ;;  %p2128_p2 = por %p2127_p1, %p2126_p0 }
 0x21b   : > { %p2122_p13 = pneg %p2121_p12 }
 0x21d   : > { %p2129_p3 = pnand %p2128_p2, %p2122_p13 }
 0x269   : > { %v1010_v45 = vpop.permute.xlu0 %1009 }
 0x26a   : > { %v1057_v49 = vadd.f32 %v1010_v45, %v2428_v40 }
 0x26b   : > { %v1012_v48 = vpop.permute.xlu1 %1011 }
 0x26c   : > { %v1058_v50 = vadd.f32 %v1012_v48, %v2440_v47 }
 0x26d   : > { %v1014_v51 = vpop.permute.xlu0 %1013 }
 0x26e   : > { %v1073_v52 = vpack.c.bf16 %v1058_v50, %v1057_v49  ;;  %v1059_v55 = vadd.f32 %v1014_v51, %v2425_v38 }
 0x26f   : > { %v1016_v54 = vpop.permute.xlu1 %1015 }
 0x270   : > { %v1060_v56 = vadd.f32 %v1016_v54, %v2434_v44  ;;  %1897 = vmatprep.mubr.msk.bf16.mxu0 %vm1120_vm0, %v1073_v52 }
 0x271   : > { %v1018_v59 = vpop.permute.xlu0 %1017 }
 0x272   : > { %v1074_v61 = vpack.c.bf16 %v1060_v56, %v1059_v55  ;;  %v1061_v63 = vadd.f32 %v1018_v59, %v2457_v60 }
 0x273   : > { %v1020_v62 = vpop.permute.xlu1 %1019 }
 0x274   : > { %v1062_v1 = vadd.f32 %v1020_v62, %v2469_v3  ;;  %1898 = vmatmul.mubr.msk.bf16.vlgmr.msra.gmra.mrb[16].mxu0 %vm1120_vm0, %v1074_v61 }
 0x275   : > { %v1022_v40 = vpop.permute.xlu0 %1021 }
 0x276   : > { %v1075_v47 = vpack.c.bf16 %v1062_v1, %v1061_v63  ;;  %v1063_v4 = vadd.f32 %v1022_v40, %v2454_v58 }
 0x277   : > { %v1024_v2 = vpop.permute.xlu1 %1023 }
 0x278   : > { %v1064_v38 = vadd.f32 %v1024_v2, %v2463_v0  ;;  %1901 = vmatprep.mubr.msk.bf16.mxu0 %vm1120_vm0, %v1075_v47 }
 0x279   : > { %v1026_v44 = vpop.permute.xlu0 %1025 }
 0x27a   : > { %v1076_v5 = vpack.c.bf16 %v1064_v38, %v1063_v4  ;;  %v1065_v6 = vadd.f32 %v1026_v44, %v2481_v16 }
 0x27b   : > { %v1028_v36 = vpop.permute.xlu1 %1027 }
 0x27c   : > { %v1066_v60 = vadd.f32 %v1028_v36, %v2493_v25  ;;  %1902 = vmatmul.mubr.msk.bf16.gmra.mrb[20].mxu0 %vm1120_vm0, %v1076_v5 }
 0x27d   : > { %v1030_v3 = vpop.permute.xlu0 %1029 }
 0x27e   : > { %v1077_v7 = vpack.c.bf16 %v1066_v60, %v1065_v6  ;;  %v1067_v9 = vadd.f32 %v1030_v3, %v2478_v13 }
 0x27f   : > { %v1032_v8 = vpop.permute.xlu1 %1031 }
 0x280   : > { %v1068_v58 = vadd.f32 %v1032_v8, %v2487_v21  ;;  %1905 = vmatprep.mubr.msk.bf16.mxu0 %vm1120_vm0, %v1077_v7 }
 0x281   : > { %v1034_v0 = vpop.permute.xlu0 %1033 }
 0x282   : > { %v1078_v10 = vpack.c.bf16 %v1068_v58, %v1067_v9  ;;  %v1069_v12 = vadd.f32 %v1034_v0, %v2509_v46  ;;  %v2021_v46 = vld [vmem:[%s2695_s8 + $0x30] sm:$0xff]  }
 0x283   : > { %v1036_v11 = vpop.permute.xlu1 %1035  ;;  %1925 = vmatprep.subr.bf16.mxu1 %v2021_v46 }
 0x284   : > { %v1070_v16 = vadd.f32 %v1036_v11, %v2522_v57  ;;  %1906 = vmatmul.mubr.msk.bf16.gmra.mrb[24].mxu0 %vm1120_vm0, %v1078_v10  ;;  %1926 = vmatpush3.bf16.msra.mxu1 %v2021_v46  ;;  %v2022_v57 = vld [vmem:[%s2695_s8 + $0x38] sm:$0xff]  }
 0x285   : > { %v1038_v25 = vpop.permute.xlu0 %1037  ;;  %1927 = vmatprep.subr.bf16.mxu1 %v2022_v57 }
 0x286   : > { %v1079_v14 = vpack.c.bf16 %v1070_v16, %v1069_v12  ;;  %v1071_v17 = vadd.f32 %v1038_v25, %v2505_v42  ;;  %v1721_v42 = vld [vmem:[%s2694_s7] ss:$0 sm:$0xff] }
 0x287   : > { %v1040_v15 = vpop.permute.xlu1 %1039 }
 0x288   : > { %v1072_v13 = vadd.f32 %v1040_v15, %v2515_v53  ;;  %1909 = vmatprep.mubr.msk.bf16.mxu0 %vm1120_vm0, %v1079_v14  ;;  %1928 = vmatpush3.bf16.msra.mxu1 %v2022_v57  ;;  %v2596_v14 = vld [vmem:[%s2696_s9] ss:$0 sm:$0xff] }
 0x28a   : > { %v1080_v21 = vpack.c.bf16 %v1072_v13, %v1071_v17 }
 0x28c   : > { %1910 = vmatmul.mubr.msk.bf16.gmra.mrb[28].mxu0 %vm1120_vm0, %v1080_v21 }
 0x347   : > { %v1899_v53 = vpop.f32.mrb[16].mxu0 }
 0x348   : > { %v1188_v18 = vadd.f32 %v1899_v53, %v1721_v42  ;;  %v1179_v19 = vpop.f32.mrb[17].mxu0 }
 0x349   : > { %v1180_v20 = vadd.f32 %v1721_v42, %v1179_v19  ;;  %v1900_v22 = vpop.f32.mrb[18].mxu0 }
 0x34a   : > { %v1191_v23 = vadd.f32 %v1900_v22, %v1721_v42  ;;  %v1182_v24 = vpop.f32.mrb[19].mxu0  ;;  %v1244_v27 = vmax.f32 %v1188_v18, 0.0 }
 0x34b   : > { %v1183_v26 = vadd.f32 %v1721_v42, %v1182_v24  ;;  %v1242_v29 = vmax.f32 %v1180_v20, 0.0 }
 0x34c   : > { %v1245_v28 = vmax.f32 %v1191_v23, 0.0 }
 0x34d   : > { %v1243_v30 = vmax.f32 %v1183_v26, 0.0 }
 0x34e   : > { %v1259_v31 = vpack.c.bf16 %v1245_v28, %v1244_v27 }
 0x34f   : > { %v1258_v32 = vpack.c.bf16 %v1243_v30, %v1242_v29  ;;  %v1903_v33 = vpop.f32.mrb[20].mxu0 }
 0x350   : > { %v1204_v34 = vadd.f32 %v1903_v33, %v1721_v42  ;;  %v1195_v35 = vpop.f32.mrb[21].mxu0 }
 0x351   : > { %v1196_v37 = vadd.f32 %v1721_v42, %v1195_v35  ;;  %v1904_v39 = vpop.f32.mrb[22].mxu0  ;;  %1929 = vmatprep.mubr.bf16.mxu1 %v1258_v32 }
 0x352   : > { %v1207_v41 = vadd.f32 %v1904_v39, %v1721_v42  ;;  %v1198_v43 = vpop.f32.mrb[23].mxu0  ;;  %1930 = vmatmul.mubr.bf16.vlgmr.msra.gmra.mrb[16].mxu1 %v1259_v31  ;;  %v1248_v48 = vmax.f32 %v1204_v34, 0.0 }
 0x353   : > { %v1199_v45 = vadd.f32 %v1721_v42, %v1198_v43  ;;  %v1246_v50 = vmax.f32 %v1196_v37, 0.0 }
 0x354   : > { %v1249_v49 = vmax.f32 %v1207_v41, 0.0 }
 0x355   : > { %v1247_v51 = vmax.f32 %v1199_v45, 0.0 }
 0x356   : > { %v1261_v52 = vpack.c.bf16 %v1249_v49, %v1248_v48 }
 0x357   : > { %v1260_v54 = vpack.c.bf16 %v1247_v51, %v1246_v50  ;;  %v1907_v55 = vpop.f32.mrb[24].mxu0 }
 0x358   : > { %v1220_v56 = vadd.f32 %v1907_v55, %v1721_v42  ;;  %v1211_v59 = vpop.f32.mrb[25].mxu0 }
 0x359   : > { %v1212_v61 = vadd.f32 %v1721_v42, %v1211_v59  ;;  %v1908_v62 = vpop.f32.mrb[26].mxu0  ;;  %1933 = vmatprep.mubr.bf16.mxu1 %v1260_v54 }
 0x35a   : > { %v1223_v63 = vadd.f32 %v1908_v62, %v1721_v42  ;;  %v1214_v1 = vpop.f32.mrb[27].mxu0  ;;  %1934 = vmatmul.mubr.bf16.gmra.mrb[20].mxu1 %v1261_v52  ;;  %v1252_v47 = vmax.f32 %v1220_v56, 0.0 }
 0x35b   : > { %v1215_v40 = vadd.f32 %v1721_v42, %v1214_v1  ;;  %v1250_v4 = vmax.f32 %v1212_v61, 0.0 }
 0x35c   : > { %v1253_v2 = vmax.f32 %v1223_v63, 0.0 }
 0x35d   : > { %v1251_v38 = vmax.f32 %v1215_v40, 0.0 }
 0x35e   : > { %v1263_v44 = vpack.c.bf16 %v1253_v2, %v1252_v47 }
 0x35f   : > { %v1262_v5 = vpack.c.bf16 %v1251_v38, %v1250_v4  ;;  %v1911_v36 = vpop.f32.mrb[28].mxu0 }
 0x360   : > { %v1236_v6 = vadd.f32 %v1911_v36, %v1721_v42  ;;  %v1227_v60 = vpop.f32.mrb[29].mxu0 }
 0x361   : > { %v1228_v3 = vadd.f32 %v1721_v42, %v1227_v60  ;;  %v1912_v7 = vpop.f32.mrb[30].mxu0  ;;  %1937 = vmatprep.mubr.bf16.mxu1 %v1262_v5 }
 0x362   : > { %v1239_v8 = vadd.f32 %v1912_v7, %v1721_v42  ;;  %v1230_v9 = vpop.f32.mrb[31].mxu0  ;;  %1938 = vmatmul.mubr.bf16.gmra.mrb[24].mxu1 %v1263_v44  ;;  %v1256_v0 = vmax.f32 %v1236_v6, 0.0 }
 0x363   : > { %v1231_v58 = vadd.f32 %v1721_v42, %v1230_v9  ;;  %v1254_v11 = vmax.f32 %v1228_v3, 0.0 }
 0x364   : > { %v1257_v10 = vmax.f32 %v1239_v8, 0.0 }
 0x365   : > { %v1255_v12 = vmax.f32 %v1231_v58, 0.0 }
 0x366   : > { %v1265_v16 = vpack.c.bf16 %v1257_v10, %v1256_v0 }
 0x367   : > { %v1264_v25 = vpack.c.bf16 %v1255_v12, %v1254_v11 }
 0x369   : > { %1941 = vmatprep.mubr.bf16.mxu1 %v1264_v25 }
 0x36a   : > { %1942 = vmatmul.mubr.bf16.gmra.mrb[28].mxu1 %v1265_v16 }
 0x425   : > { %v1931_v15 = vpop.f32.mrb[16].mxu1 }
 0x426   : > { %v1380_v17 = vadd.f32 %v1931_v15, %v2596_v14  ;;  %v1371_v13 = vpop.f32.mrb[17].mxu1 }
 0x427   : > { %v1372_v21 = vadd.f32 %v2596_v14, %v1371_v13  ;;  %v1932_v46 = vpop.f32.mrb[18].mxu1 }
 0x428   : > { %v1745_v57 = vmul.f32 -1.442695, %v1380_v17  ;;  %v1383_v42 = vadd.f32 %v1932_v46, %v2596_v14  ;;  %v1374_v53 = vpop.f32.mrb[19].mxu1 }
 0x429   : > { %v1743_v18 = vmul.f32 -1.442695, %v1372_v21  ;;  %v1375_v19 = vadd.f32 %v2596_v14, %v1374_v53 }
 0x42a   : > { %2055 = vpow2.f32 %v1745_v57  ;;  %v1746_v20 = vmul.f32 -1.442695, %v1383_v42 }
 0x42b   : > { %2057 = vpow2.f32 %v1743_v18  ;;  %v1744_v22 = vmul.f32 -1.442695, %v1375_v19 }
 0x42c   : > { %2059 = vpow2.f32 %v1746_v20 }
 0x42d   : > { %2061 = vpow2.f32 %v1744_v22  ;;  %v1935_v23 = vpop.f32.mrb[20].mxu1 }
 0x42e   : > { %v1396_v24 = vadd.f32 %v1935_v23, %v2596_v14  ;;  %v1387_v26 = vpop.f32.mrb[21].mxu1 }
 0x42f   : > { %v1388_v27 = vadd.f32 %v2596_v14, %v1387_v26  ;;  %v1936_v28 = vpop.f32.mrb[22].mxu1 }
 0x430   : > { %v1749_v29 = vmul.f32 -1.442695, %v1396_v24  ;;  %v1399_v30 = vadd.f32 %v1936_v28, %v2596_v14  ;;  %v1390_v31 = vpop.f32.mrb[23].mxu1 }
 0x431   : > { %v1747_v32 = vmul.f32 -1.442695, %v1388_v27  ;;  %v1391_v33 = vadd.f32 %v2596_v14, %v1390_v31 }
 0x432   : > { %2063 = vpow2.f32 %v1749_v29  ;;  %v1750_v34 = vmul.f32 -1.442695, %v1399_v30 }
 0x433   : > { %2065 = vpow2.f32 %v1747_v32  ;;  %v1748_v35 = vmul.f32 -1.442695, %v1391_v33 }
 0x434   : > { %v2056_v37 = vpop.eup %2055  ;;  %2067 = vpow2.f32 %v1750_v34 }
 0x435   : > { %v2058_v39 = vpop.eup %2057  ;;  %v1484_v41 = vadd.f32 1.0, %v2056_v37  ;;  %2069 = vpow2.f32 %v1748_v35  ;;  %v1939_v43 = vpop.f32.mrb[24].mxu1 }
 0x436   : > { %v2060_v45 = vpop.eup %2059  ;;  %v1482_v48 = vadd.f32 1.0, %v2058_v39  ;;  %v1412_v49 = vadd.f32 %v1939_v43, %v2596_v14  ;;  %v1403_v50 = vpop.f32.mrb[25].mxu1 }
 0x437   : > { %v2062_v51 = vpop.eup %2061  ;;  %2071 = vrcp.f32 %v1484_v41  ;;  %v1485_v52 = vadd.f32 1.0, %v2060_v45  ;;  %v1404_v54 = vadd.f32 %v2596_v14, %v1403_v50  ;;  %v1940_v55 = vpop.f32.mrb[26].mxu1 }
 0x438   : > { %2073 = vrcp.f32 %v1482_v48  ;;  %v1483_v56 = vadd.f32 1.0, %v2062_v51  ;;  %v1753_v59 = vmul.f32 -1.442695, %v1412_v49  ;;  %v1415_v61 = vadd.f32 %v1940_v55, %v2596_v14  ;;  %v1406_v62 = vpop.f32.mrb[27].mxu1 }
 0x439   : > { %2075 = vrcp.f32 %v1485_v52  ;;  %v1751_v63 = vmul.f32 -1.442695, %v1404_v54  ;;  %v1407_v1 = vadd.f32 %v2596_v14, %v1406_v62 }
 0x43a   : > { %2077 = vrcp.f32 %v1483_v56  ;;  %v1754_v40 = vmul.f32 -1.442695, %v1415_v61 }
 0x43b   : > { %2079 = vpow2.f32 %v1753_v59  ;;  %v1752_v47 = vmul.f32 -1.442695, %v1407_v1 }
 0x43c   : > { %v2064_v2 = vpop.eup %2063  ;;  %2081 = vpow2.f32 %v1751_v63 }
 0x43d   : > { %v2066_v4 = vpop.eup %2065  ;;  %v1488_v38 = vadd.f32 1.0, %v2064_v2  ;;  %2083 = vpow2.f32 %v1754_v40  ;;  %v1943_v44 = vpop.f32.mrb[28].mxu1 }
 0x43e   : > { %v2068_v5 = vpop.eup %2067  ;;  %v1486_v36 = vadd.f32 1.0, %v2066_v4  ;;  %2085 = vpow2.f32 %v1752_v47  ;;  %v1428_v6 = vadd.f32 %v1943_v44, %v2596_v14  ;;  %v1419_v60 = vpop.f32.mrb[29].mxu1 }
 0x43f   : > { %v2070_v3 = vpop.eup %2069  ;;  %2087 = vrcp.f32 %v1488_v38  ;;  %v1489_v7 = vadd.f32 1.0, %v2068_v5  ;;  %v1420_v8 = vadd.f32 %v2596_v14, %v1419_v60  ;;  %v1944_v9 = vpop.f32.mrb[30].mxu1 }
 0x440   : > { %2089 = vrcp.f32 %v1486_v36  ;;  %v1487_v58 = vadd.f32 1.0, %v2070_v3  ;;  %v1757_v0 = vmul.f32 -1.442695, %v1428_v6  ;;  %v1431_v10 = vadd.f32 %v1944_v9, %v2596_v14  ;;  %v1422_v11 = vpop.f32.mrb[31].mxu1 }
 0x441   : > { %v2072_v12 = vpop.eup %2071  ;;  %2091 = vrcp.f32 %v1489_v7  ;;  %v1755_v16 = vmul.f32 -1.442695, %v1420_v8  ;;  %v1423_v25 = vadd.f32 %v2596_v14, %v1422_v11 }
 0x442   : > { %v2074_v15 = vpop.eup %2073  ;;  %1532 = vst [vmem:[%s2617_s22 + $0x10] sm:$0xff] %v2072_v12  ;;  %2093 = vrcp.f32 %v1487_v58  ;;  %v1758_v17 = vmul.f32 -1.442695, %v1431_v10 }
 0x443   : > { %v2076_v13 = vpop.eup %2075  ;;  %1530 = vst [vmem:[%s2617_s22] sm:$0xff] %v2074_v15  ;;  %2095 = vpow2.f32 %v1757_v0  ;;  %v1756_v21 = vmul.f32 -1.442695, %v1423_v25 }
 0x444   : > { %v2078_v46 = vpop.eup %2077  ;;  %1533 = vst [vmem:[%s2617_s22 + $0x18] sm:$0xff] %v2076_v13  ;;  %2097 = vpow2.f32 %v1755_v16 }
 0x445   : > { %v2080_v57 = vpop.eup %2079  ;;  %1531 = vst [vmem:[%s2617_s22 + $0x8] sm:$0xff] %v2078_v46  ;;  %2099 = vpow2.f32 %v1758_v17 }
 0x446   : > { %v2082_v14 = vpop.eup %2081  ;;  %v1492_v42 = vadd.f32 1.0, %v2080_v57  ;;  %2101 = vpow2.f32 %v1756_v21 }
 0x447   : > { %v2084_v53 = vpop.eup %2083  ;;  %v1490_v18 = vadd.f32 1.0, %v2082_v14 }
 0x448   : > { %v2086_v19 = vpop.eup %2085  ;;  %2103 = vrcp.f32 %v1492_v42  ;;  %v1493_v20 = vadd.f32 1.0, %v2084_v53 }
 0x449   : > { %v2088_v22 = vpop.eup %2087  ;;  %2105 = vrcp.f32 %v1490_v18  ;;  %v1491_v23 = vadd.f32 1.0, %v2086_v19 }
 0x44a   : > { %v2090_v24 = vpop.eup %2089  ;;  %1536 = vst [vmem:[%s2617_s22 + $0x30] sm:$0xff] %v2088_v22  ;;  %2107 = vrcp.f32 %v1493_v20 }
 0x44b   : > { %v2092_v26 = vpop.eup %2091  ;;  %1534 = vst [vmem:[%s2617_s22 + $0x20] sm:$0xff] %v2090_v24  ;;  %2109 = vrcp.f32 %v1491_v23 }
 0x44c   : > { %v2094_v27 = vpop.eup %2093  ;;  %1537 = vst [vmem:[%s2617_s22 + $0x38] sm:$0xff] %v2092_v26 }
 0x44d   : > { %v2096_v28 = vpop.eup %2095  ;;  %1535 = vst [vmem:[%s2617_s22 + $0x28] sm:$0xff] %v2094_v27 }
 0x44e   : > { %v2098_v29 = vpop.eup %2097  ;;  %v1496_v30 = vadd.f32 1.0, %v2096_v28 }
 0x44f   : > { %v2100_v31 = vpop.eup %2099  ;;  %v1494_v32 = vadd.f32 1.0, %v2098_v29 }
 0x450   : > { %v2102_v33 = vpop.eup %2101  ;;  %2111 = vrcp.f32 %v1496_v30  ;;  %v1497_v34 = vadd.f32 1.0, %v2100_v31 }
 0x451   : > { %2113 = vrcp.f32 %v1494_v32  ;;  %v1495_v35 = vadd.f32 1.0, %v2102_v33 }
 0x452   : > { %v2104_v37 = vpop.eup %2103  ;;  %2115 = vrcp.f32 %v1497_v34 }
 0x453   : > { %v2106_v39 = vpop.eup %2105  ;;  %1540 = vst [vmem:[%s2617_s22 + $0x50] sm:$0xff] %v2104_v37  ;;  %2117 = vrcp.f32 %v1495_v35 }
 0x454   : > { %v2108_v41 = vpop.eup %2107  ;;  %1538 = vst [vmem:[%s2617_s22 + $0x40] sm:$0xff] %v2106_v39 }
 0x455   : > { %v2110_v43 = vpop.eup %2109  ;;  %1541 = vst [vmem:[%s2617_s22 + $0x58] sm:$0xff] %v2108_v41 }
 0x456   : > { %1539 = vst [vmem:[%s2617_s22 + $0x48] sm:$0xff] %v2110_v43 }
 0x45a   : > { %v2112_v45 = vpop.eup %2111 }
 0x45b   : > { %v2114_v48 = vpop.eup %2113  ;;  %1544 = vst [vmem:[%s2617_s22 + $0x70] sm:$0xff] %v2112_v45 }
 0x45c   : > { %v2116_v49 = vpop.eup %2115  ;;  %1542 = vst [vmem:[%s2617_s22 + $0x60] sm:$0xff] %v2114_v48 }
 0x45d   : > { %v2118_v50 = vpop.eup %2117  ;;  %1545 = vst [vmem:[%s2617_s22 + $0x78] sm:$0xff] %v2116_v49 }
 0x45e   : > { %1543 = vst [vmem:[%s2617_s22 + $0x68] sm:$0xff] %v2118_v50 }
 0x45f   : > { %2132 = shalt.err (!%p2129_p3)
}
 0x460   : > { %s2133_s15 = scalar_lea.hbm %s2637_s0, 2048  ;;  %s2137_s16 = scalar_lea.hbm %s2697_s10, 4096 }
 0x461   : > { %p2134_p4 = scmp.ne.s32.totalorder %s2637_s0, %s2133_s15  ;;  %p2138_p9 = scmp.lt.u32.totalorder %s2637_s0, %s2697_s10 }
 0x462   : > { %p2139_p10 = scmp.lt.u32.totalorder %s2137_s16, %s2133_s15  ;;  %p2141_p12 = scmp.lt.u32.totalorder %s2133_s15, %s2637_s0 }
 0x463   : > { %p2135_p7 = pnand %p2134_p4, %p2285_p5 }
 0x464   : > { %p2140_p11 = por %p2139_p10, %p2138_p9 }
 0x465   : > { %p2136_p8 = pneg %p2135_p7 }
 0x466   : > { %p2142_p13 = por %p2141_p12, %p2140_p11 }
 0x468   : > { %p2143_p0 = pnand %p2142_p13, %p2136_p8 }
 0x46a   : > { %2146 = shalt.err (!%p2143_p0)
}
 0x46b   : > { %s2185_s26 = smov 128   ;;  %s2186_s30 = smov 8  }
 0x46c   : > { %1945 = dma.vmem_to_hbm [thread:$0]  (%p2285_p5), %s2639_s29, 2048, %s2637_s0, %s2646_s21, %s2185_s26, %s2185_s26, %s2186_s30  }
 0x46d PF: > { %p1951_p1 = scmp.ge.s32.totalorder %s2181_s20, 2  ;;  %s1600_s13 = sand.u32 1, %s2169_s17  }
 0x46e   : > { %s1601_s14 = scalar_lea.sflag [#allocation3], %s1600_s13 }
 0x46f   : > { %p1948_p2 = pnand %p1951_p1, %p2289_p6 }
 0x471   : > { %2164 = dma.done.wait (!%p1948_p2), %s1601_s14, 2048  }
 0x472   : > { %2166 = vsyncadd (!%p1948_p2), %s1601_s14, 4294965248  ;;  %s2704_s15 = sld [smem:[#allocation5_spill]]  ;;  %p22_p3 = scmp.ge.s32.totalorder %s2272_s23, 4  }
 0x473   : > { %s2705_s17 = smov %s2173_s18  ;;  %s2706_s18 = smov %s2177_s19 }
 0x474   : > { %s2708_s20 = smov %s2272_s23  ;;  %24 = sbr.rel (!%p22_p3) target bundleno = 5 (0x5), region = 110 }
 0x478   : > { %s2707_s19 = smov %s2704_s15 }
 0x47b   :  { %1614 = vsyncpa [#allocation3], 1 }
 0x47c   :  { %1616 = vsyncpa [#allocation3 + $0x1], 1 }

</bundles_post_ra>
